<compile_context>
chip_gen: v7x
topology: tpu7x:2x2x1
jax: 0.10.0
libtpu: 0.0.40
codegen_flags: <defaults>
</compile_context>

<pallas_src>
import functools

import jax
import jax.numpy as jnp
from jax.experimental import pallas as pl
from jax.experimental.pallas import tpu as pltpu


def _round_up(x, m):
    return ((x + m - 1) // m) * m


def prepare_embedding_table(table):
    """One-time parameter prep (hoisted out of the forward pass): cast to f32
    and zero-pad the embedding dim to a multiple of 128 lanes. Zero padding
    keeps the dot product exact."""
    n, d = table.shape
    dp = _round_up(d, 128)
    return jnp.zeros((n, dp), jnp.float32).at[:, :d].set(table.astype(jnp.float32))


def _mf_kernel(u_idx_ref, i_idx_ref, u_tab_ref, i_tab_ref, o_ref, prod_ref, *,
               batch, num_users, num_items):
    """Single invocation (no grid).

    u_idx_ref / i_idx_ref : (B,) int32 in SMEM
    u_tab_ref / i_tab_ref : (N, Dp) f32 whole tables in VMEM
    o_ref                 : (Bs, 1) f32 sublane-major output, Bs = round_up(B, 8)
    prod_ref              : (Bs, Dp) f32 VMEM scratch (one vreg at B=8)
    """
    # Zero only the live scratch region so padded rows (>= batch) reduce to a
    # defined 0 in the padded output rows.
    prod_ref[...] = jnp.zeros_like(prod_ref)

    def gather_row(b, carry):
        # Clamp untrusted indices: no runtime bounds check on dynamic VMEM
        # reads on TPU.
        u_i = jnp.clip(u_idx_ref[b], 0, num_users - 1)
        i_i = jnp.clip(i_idx_ref[b], 0, num_items - 1)
        u = u_tab_ref[pl.ds(u_i, 1), :]          # (1, Dp) dynamic row read
        v = i_tab_ref[pl.ds(i_i, 1), :]          # (1, Dp)
        prod_ref[pl.ds(b, 1), :] = u * v         # VPU mul, one row store
        return carry

    # Short fixed trip count (B=8) -> unroll for LLO scheduler visibility.
    # (If B is ever made large, switch to unroll=False / a tiled grid and a
    #  bulk two-scratch multiply instead of per-row partial-vreg muls.)
    jax.lax.fori_loop(0, batch, gather_row, 0, unroll=True)

    # ONE bulk lane-axis reduce -> one value per sublane row, stored
    # sublane-major: no sublane->lane relayout, no 128-lane padding.
    o_ref[...] = jnp.sum(prod_ref[...], axis=1, keepdims=True)


def mf_forward(user_indices, item_indices, user_table_padded, item_table_padded):
    """dot[b] = sum_d user_table[user_indices[b], d] * item_table[item_indices[b], d]

    Tables must already be prepared with `prepare_embedding_table` (f32,
    embedding dim padded to a multiple of 128)."""
    B = user_indices.shape[0]
    n_users, dp = user_table_padded.shape
    n_items, dp2 = item_table_padded.shape
    assert dp == dp2 and dp % 128 == 0

    bs = _round_up(B, 8)                      # sublane-padded batch rows

    kernel = functools.partial(_mf_kernel, batch=B,
                               num_users=n_users, num_items=n_items)

    out = pl.pallas_call(
        kernel,
        out_shape=jax.ShapeDtypeStruct((bs, 1), jnp.float32),
        in_specs=[
            pl.BlockSpec(memory_space=pltpu.MemorySpace.SMEM),   # user idx
            pl.BlockSpec(memory_space=pltpu.MemorySpace.SMEM),   # item idx
            pl.BlockSpec(memory_space=pltpu.MemorySpace.VMEM),   # user table
            pl.BlockSpec(memory_space=pltpu.MemorySpace.VMEM),   # item table
        ],
        out_specs=pl.BlockSpec(memory_space=pltpu.MemorySpace.VMEM),
        scratch_shapes=[pltpu.VMEM((bs, dp), jnp.float32)],
    )(user_indices.astype(jnp.int32), item_indices.astype(jnp.int32),
      user_table_padded, item_table_padded)

    return out[:B, 0]


if __name__ == "__main__":
    # Module defaults: num_users=100, num_items=100, embedding_dim=50.
    num_users, num_items, embedding_dim = 100, 100, 50
    B = 8

    key = jax.random.PRNGKey(0)
    k_u, k_i, k_ui, k_ii = jax.random.split(key, 4)
    # nn.Embedding default init ~ N(0, 1)
    user_table = jax.random.normal(k_u, (num_users, embedding_dim), jnp.float32)
    item_table = jax.random.normal(k_i, (num_items, embedding_dim), jnp.float32)
    user_idx = jax.random.randint(k_ui, (B,), 0, num_users, dtype=jnp.int32)
    item_idx = jax.random.randint(k_ii, (B,), 0, num_items, dtype=jnp.int32)

    # One-time parameter preparation (not part of the per-call forward).
    u_tab_p = jax.block_until_ready(prepare_embedding_table(user_table))
    i_tab_p = jax.block_until_ready(prepare_embedding_table(item_table))

    out = jax.block_until_ready(mf_forward(user_idx, item_idx, u_tab_p, i_tab_p))

    # Pure-JAX reference for correctness.
    ref = jnp.sum(user_table[user_idx] * item_table[item_idx], axis=1)
    assert out.shape == (B,), out.shape
    assert jnp.allclose(out, ref, atol=1e-5, rtol=1e-5), (out, ref)

    print("KERNEL_OK")
</pallas_src>

<mosaic_0001>
module attributes {stable_mosaic.version = 11 : i64} {
  func.func @_mf_kernel(%arg0: memref<8xi32, #tpu.memory_space<smem>>, %arg1: memref<8xi32, #tpu.memory_space<smem>>, %arg2: memref<100x128xf32, #tpu.memory_space<vmem>>, %arg3: memref<100x128xf32, #tpu.memory_space<vmem>>, %arg4: memref<8x1xf32, #tpu.memory_space<vmem>>, %arg5: memref<8x128xf32, #tpu.memory_space<vmem>>) attributes {dimension_semantics = [], scalar_prefetch = 0 : i64, scratch_operands = 1 : i64, tpu.core_type = #tpu.core_type<tc>} {
    %cst = arith.constant 0.000000e+00 : f32
    %0 = vector.broadcast %cst : f32 to vector<8x128xf32>
    %c0 = arith.constant 0 : index
    %c0_0 = arith.constant 0 : index
    %1 = vector.load %arg5[%c0, %c0_0] : memref<8x128xf32, #tpu.memory_space<vmem>>, vector<8x128xf32>
    tpu.vector_store %arg5[%c0, %c0_0], %0 {strides = array<i32>} : memref<8x128xf32, #tpu.memory_space<vmem>>, vector<8x128xf32>,
    %c0_i32 = arith.constant 0 : i32
    %2 = arith.index_cast %c0_i32 : i32 to index
    %3 = memref.load %arg0[%2] : memref<8xi32, #tpu.memory_space<smem>>
    %c0_i32_1 = arith.constant 0 : i32
    %c99_i32 = arith.constant 99 : i32
    %4 = arith.maxsi %c0_i32_1, %3 : i32
    %5 = arith.minsi %c99_i32, %4 : i32
    %6 = arith.index_cast %c0_i32 : i32 to index
    %7 = memref.load %arg1[%6] : memref<8xi32, #tpu.memory_space<smem>>
    %c0_i32_2 = arith.constant 0 : i32
    %c99_i32_3 = arith.constant 99 : i32
    %8 = arith.maxsi %c0_i32_2, %7 : i32
    %9 = arith.minsi %c99_i32_3, %8 : i32
    %10 = arith.index_cast %5 : i32 to index
    %c0_4 = arith.constant 0 : index
    %11 = vector.load %arg2[%10, %c0_4] : memref<100x128xf32, #tpu.memory_space<vmem>>, vector<1x128xf32>
    %12 = arith.index_cast %9 : i32 to index
    %c0_5 = arith.constant 0 : index
    %13 = vector.load %arg3[%12, %c0_5] : memref<100x128xf32, #tpu.memory_space<vmem>>, vector<1x128xf32>
    %14 = arith.mulf %11, %13 : vector<1x128xf32>
    %15 = arith.index_cast %c0_i32 : i32 to index
    %c0_6 = arith.constant 0 : index
    %16 = vector.load %arg5[%15, %c0_6] : memref<8x128xf32, #tpu.memory_space<vmem>>, vector<1x128xf32>
    tpu.vector_store %arg5[%15, %c0_6], %14 {strides = array<i32>} : memref<8x128xf32, #tpu.memory_space<vmem>>, vector<1x128xf32>,
    %c1_i32 = arith.constant 1 : i32
    %17 = arith.index_cast %c1_i32 : i32 to index
    %18 = memref.load %arg0[%17] : memref<8xi32, #tpu.memory_space<smem>>
    %c0_i32_7 = arith.constant 0 : i32
    %c99_i32_8 = arith.constant 99 : i32
    %19 = arith.maxsi %c0_i32_7, %18 : i32
    %20 = arith.minsi %c99_i32_8, %19 : i32
    %21 = arith.index_cast %c1_i32 : i32 to index
    %22 = memref.load %arg1[%21] : memref<8xi32, #tpu.memory_space<smem>>
    %c0_i32_9 = arith.constant 0 : i32
    %c99_i32_10 = arith.constant 99 : i32
    %23 = arith.maxsi %c0_i32_9, %22 : i32
    %24 = arith.minsi %c99_i32_10, %23 : i32
    %25 = arith.index_cast %20 : i32 to index
    %c0_11 = arith.constant 0 : index
    %26 = vector.load %arg2[%25, %c0_11] : memref<100x128xf32, #tpu.memory_space<vmem>>, vector<1x128xf32>
    %27 = arith.index_cast %24 : i32 to index
    %c0_12 = arith.constant 0 : index
    %28 = vector.load %arg3[%27, %c0_12] : memref<100x128xf32, #tpu.memory_space<vmem>>, vector<1x128xf32>
    %29 = arith.mulf %26, %28 : vector<1x128xf32>
    %30 = arith.index_cast %c1_i32 : i32 to index
    %c0_13 = arith.constant 0 : index
    %31 = vector.load %arg5[%30, %c0_13] : memref<8x128xf32, #tpu.memory_space<vmem>>, vector<1x128xf32>
    tpu.vector_store %arg5[%30, %c0_13], %29 {strides = array<i32>} : memref<8x128xf32, #tpu.memory_space<vmem>>, vector<1x128xf32>,
    %c2_i32 = arith.constant 2 : i32
    %32 = arith.index_cast %c2_i32 : i32 to index
    %33 = memref.load %arg0[%32] : memref<8xi32, #tpu.memory_space<smem>>
    %c0_i32_14 = arith.constant 0 : i32
    %c99_i32_15 = arith.constant 99 : i32
    %34 = arith.maxsi %c0_i32_14, %33 : i32
    %35 = arith.minsi %c99_i32_15, %34 : i32
    %36 = arith.index_cast %c2_i32 : i32 to index
    %37 = memref.load %arg1[%36] : memref<8xi32, #tpu.memory_space<smem>>
    %c0_i32_16 = arith.constant 0 : i32
    %c99_i32_17 = arith.constant 99 : i32
    %38 = arith.maxsi %c0_i32_16, %37 : i32
    %39 = arith.minsi %c99_i32_17, %38 : i32
    %40 = arith.index_cast %35 : i32 to index
    %c0_18 = arith.constant 0 : index
    %41 = vector.load %arg2[%40, %c0_18] : memref<100x128xf32, #tpu.memory_space<vmem>>, vector<1x128xf32>
    %42 = arith.index_cast %39 : i32 to index
    %c0_19 = arith.constant 0 : index
    %43 = vector.load %arg3[%42, %c0_19] : memref<100x128xf32, #tpu.memory_space<vmem>>, vector<1x128xf32>
    %44 = arith.mulf %41, %43 : vector<1x128xf32>
    %45 = arith.index_cast %c2_i32 : i32 to index
    %c0_20 = arith.constant 0 : index
    %46 = vector.load %arg5[%45, %c0_20] : memref<8x128xf32, #tpu.memory_space<vmem>>, vector<1x128xf32>
    tpu.vector_store %arg5[%45, %c0_20], %44 {strides = array<i32>} : memref<8x128xf32, #tpu.memory_space<vmem>>, vector<1x128xf32>,
    %c3_i32 = arith.constant 3 : i32
    %47 = arith.index_cast %c3_i32 : i32 to index
    %48 = memref.load %arg0[%47] : memref<8xi32, #tpu.memory_space<smem>>
    %c0_i32_21 = arith.constant 0 : i32
    %c99_i32_22 = arith.constant 99 : i32
    %49 = arith.maxsi %c0_i32_21, %48 : i32
    %50 = arith.minsi %c99_i32_22, %49 : i32
    %51 = arith.index_cast %c3_i32 : i32 to index
    %52 = memref.load %arg1[%51] : memref<8xi32, #tpu.memory_space<smem>>
    %c0_i32_23 = arith.constant 0 : i32
    %c99_i32_24 = arith.constant 99 : i32
    %53 = arith.maxsi %c0_i32_23, %52 : i32
    %54 = arith.minsi %c99_i32_24, %53 : i32
    %55 = arith.index_cast %50 : i32 to index
    %c0_25 = arith.constant 0 : index
    %56 = vector.load %arg2[%55, %c0_25] : memref<100x128xf32, #tpu.memory_space<vmem>>, vector<1x128xf32>
    %57 = arith.index_cast %54 : i32 to index
    %c0_26 = arith.constant 0 : index
    %58 = vector.load %arg3[%57, %c0_26] : memref<100x128xf32, #tpu.memory_space<vmem>>, vector<1x128xf32>
    %59 = arith.mulf %56, %58 : vector<1x128xf32>
    %60 = arith.index_cast %c3_i32 : i32 to index
    %c0_27 = arith.constant 0 : index
    %61 = vector.load %arg5[%60, %c0_27] : memref<8x128xf32, #tpu.memory_space<vmem>>, vector<1x128xf32>
    tpu.vector_store %arg5[%60, %c0_27], %59 {strides = array<i32>} : memref<8x128xf32, #tpu.memory_space<vmem>>, vector<1x128xf32>,
    %c4_i32 = arith.constant 4 : i32
    %62 = arith.index_cast %c4_i32 : i32 to index
    %63 = memref.load %arg0[%62] : memref<8xi32, #tpu.memory_space<smem>>
    %c0_i32_28 = arith.constant 0 : i32
    %c99_i32_29 = arith.constant 99 : i32
    %64 = arith.maxsi %c0_i32_28, %63 : i32
    %65 = arith.minsi %c99_i32_29, %64 : i32
    %66 = arith.index_cast %c4_i32 : i32 to index
    %67 = memref.load %arg1[%66] : memref<8xi32, #tpu.memory_space<smem>>
    %c0_i32_30 = arith.constant 0 : i32
    %c99_i32_31 = arith.constant 99 : i32
    %68 = arith.maxsi %c0_i32_30, %67 : i32
    %69 = arith.minsi %c99_i32_31, %68 : i32
    %70 = arith.index_cast %65 : i32 to index
    %c0_32 = arith.constant 0 : index
    %71 = vector.load %arg2[%70, %c0_32] : memref<100x128xf32, #tpu.memory_space<vmem>>, vector<1x128xf32>
    %72 = arith.index_cast %69 : i32 to index
    %c0_33 = arith.constant 0 : index
    %73 = vector.load %arg3[%72, %c0_33] : memref<100x128xf32, #tpu.memory_space<vmem>>, vector<1x128xf32>
    %74 = arith.mulf %71, %73 : vector<1x128xf32>
    %75 = arith.index_cast %c4_i32 : i32 to index
    %c0_34 = arith.constant 0 : index
    %76 = vector.load %arg5[%75, %c0_34] : memref<8x128xf32, #tpu.memory_space<vmem>>, vector<1x128xf32>
    tpu.vector_store %arg5[%75, %c0_34], %74 {strides = array<i32>} : memref<8x128xf32, #tpu.memory_space<vmem>>, vector<1x128xf32>,
    %c5_i32 = arith.constant 5 : i32
    %77 = arith.index_cast %c5_i32 : i32 to index
    %78 = memref.load %arg0[%77] : memref<8xi32, #tpu.memory_space<smem>>
    %c0_i32_35 = arith.constant 0 : i32
    %c99_i32_36 = arith.constant 99 : i32
    %79 = arith.maxsi %c0_i32_35, %78 : i32
    %80 = arith.minsi %c99_i32_36, %79 : i32
    %81 = arith.index_cast %c5_i32 : i32 to index
    %82 = memref.load %arg1[%81] : memref<8xi32, #tpu.memory_space<smem>>
    %c0_i32_37 = arith.constant 0 : i32
    %c99_i32_38 = arith.constant 99 : i32
    %83 = arith.maxsi %c0_i32_37, %82 : i32
    %84 = arith.minsi %c99_i32_38, %83 : i32
    %85 = arith.index_cast %80 : i32 to index
    %c0_39 = arith.constant 0 : index
    %86 = vector.load %arg2[%85, %c0_39] : memref<100x128xf32, #tpu.memory_space<vmem>>, vector<1x128xf32>
    %87 = arith.index_cast %84 : i32 to index
    %c0_40 = arith.constant 0 : index
    %88 = vector.load %arg3[%87, %c0_40] : memref<100x128xf32, #tpu.memory_space<vmem>>, vector<1x128xf32>
    %89 = arith.mulf %86, %88 : vector<1x128xf32>
    %90 = arith.index_cast %c5_i32 : i32 to index
    %c0_41 = arith.constant 0 : index
    %91 = vector.load %arg5[%90, %c0_41] : memref<8x128xf32, #tpu.memory_space<vmem>>, vector<1x128xf32>
    tpu.vector_store %arg5[%90, %c0_41], %89 {strides = array<i32>} : memref<8x128xf32, #tpu.memory_space<vmem>>, vector<1x128xf32>,
    %c6_i32 = arith.constant 6 : i32
    %92 = arith.index_cast %c6_i32 : i32 to index
    %93 = memref.load %arg0[%92] : memref<8xi32, #tpu.memory_space<smem>>
    %c0_i32_42 = arith.constant 0 : i32
    %c99_i32_43 = arith.constant 99 : i32
    %94 = arith.maxsi %c0_i32_42, %93 : i32
    %95 = arith.minsi %c99_i32_43, %94 : i32
    %96 = arith.index_cast %c6_i32 : i32 to index
    %97 = memref.load %arg1[%96] : memref<8xi32, #tpu.memory_space<smem>>
    %c0_i32_44 = arith.constant 0 : i32
    %c99_i32_45 = arith.constant 99 : i32
    %98 = arith.maxsi %c0_i32_44, %97 : i32
    %99 = arith.minsi %c99_i32_45, %98 : i32
    %100 = arith.index_cast %95 : i32 to index
    %c0_46 = arith.constant 0 : index
    %101 = vector.load %arg2[%100, %c0_46] : memref<100x128xf32, #tpu.memory_space<vmem>>, vector<1x128xf32>
    %102 = arith.index_cast %99 : i32 to index
    %c0_47 = arith.constant 0 : index
    %103 = vector.load %arg3[%102, %c0_47] : memref<100x128xf32, #tpu.memory_space<vmem>>, vector<1x128xf32>
    %104 = arith.mulf %101, %103 : vector<1x128xf32>
    %105 = arith.index_cast %c6_i32 : i32 to index
    %c0_48 = arith.constant 0 : index
    %106 = vector.load %arg5[%105, %c0_48] : memref<8x128xf32, #tpu.memory_space<vmem>>, vector<1x128xf32>
    tpu.vector_store %arg5[%105, %c0_48], %104 {strides = array<i32>} : memref<8x128xf32, #tpu.memory_space<vmem>>, vector<1x128xf32>,
    %c7_i32 = arith.constant 7 : i32
    %107 = arith.index_cast %c7_i32 : i32 to index
    %108 = memref.load %arg0[%107] : memref<8xi32, #tpu.memory_space<smem>>
    %c0_i32_49 = arith.constant 0 : i32
    %c99_i32_50 = arith.constant 99 : i32
    %109 = arith.maxsi %c0_i32_49, %108 : i32
    %110 = arith.minsi %c99_i32_50, %109 : i32
    %111 = arith.index_cast %c7_i32 : i32 to index
    %112 = memref.load %arg1[%111] : memref<8xi32, #tpu.memory_space<smem>>
    %c0_i32_51 = arith.constant 0 : i32
    %c99_i32_52 = arith.constant 99 : i32
    %113 = arith.maxsi %c0_i32_51, %112 : i32
    %114 = arith.minsi %c99_i32_52, %113 : i32
    %115 = arith.index_cast %110 : i32 to index
    %c0_53 = arith.constant 0 : index
    %116 = vector.load %arg2[%115, %c0_53] : memref<100x128xf32, #tpu.memory_space<vmem>>, vector<1x128xf32>
    %117 = arith.index_cast %114 : i32 to index
    %c0_54 = arith.constant 0 : index
    %118 = vector.load %arg3[%117, %c0_54] : memref<100x128xf32, #tpu.memory_space<vmem>>, vector<1x128xf32>
    %119 = arith.mulf %116, %118 : vector<1x128xf32>
    %120 = arith.index_cast %c7_i32 : i32 to index
    %c0_55 = arith.constant 0 : index
    %121 = vector.load %arg5[%120, %c0_55] : memref<8x128xf32, #tpu.memory_space<vmem>>, vector<1x128xf32>
    tpu.vector_store %arg5[%120, %c0_55], %119 {strides = array<i32>} : memref<8x128xf32, #tpu.memory_space<vmem>>, vector<1x128xf32>,
    %c8_i32 = arith.constant 8 : i32
    %c0_56 = arith.constant 0 : index
    %c0_57 = arith.constant 0 : index
    %122 = vector.load %arg5[%c0_56, %c0_57] : memref<8x128xf32, #tpu.memory_space<vmem>>, vector<8x128xf32>
    %cst_58 = arith.constant dense<0.000000e+00> : vector<8xf32>
    %123 = vector.multi_reduction <add>, %122, %cst_58 [1] : vector<8x128xf32> to vector<8xf32>
    %124 = vector.shape_cast %123 : vector<8xf32> to vector<8x1xf32>
    %c0_59 = arith.constant 0 : index
    %c0_60 = arith.constant 0 : index
    %125 = vector.load %arg4[%c0_59, %c0_60] : memref<8x1xf32, #tpu.memory_space<vmem>>, vector<8x1xf32>
    tpu.vector_store %arg4[%c0_59, %c0_60], %124 {strides = array<i32>} : memref<8x1xf32, #tpu.memory_space<vmem>>, vector<8x1xf32>,
    return
  }
}

</mosaic_0001>

<bundles_post_ra>
// kernel: tpu_custom_call.1
= control target key start
LH: loop header
LB: loop body
LE: loop exit
PB: predicated region body
PF: predicated region fallthrough
CT: control target
= control target key end

     0   :  { %9 = vsyncpa [#allocation5], 0  ;;  %s552_s0 = inlined_call_operand.hbm [shape: s32[8], index: 0, kind: input, shape index: {}]   ;;  %s553_s1 = inlined_call_operand.vmem [shape: s32[8], index: 1, kind: input, shape index: {}]   ;;  %s554_s2 = inlined_call_operand.hbm [shape: f32[100,128], index: 2, kind: input, shape index: {}]   ;;  %s555_s3 = inlined_call_operand.hbm [shape: f32[100,128], index: 3, kind: input, shape index: {}]   ;;  %s556_s4 = inlined_call_operand.vmem [shape: f32[8,1], index: 4, kind: output, shape index: {}]  }
   0x1   :  { %10 = vsyncpa [#allocation6], 0 }
   0x2   :  { %11 = vsyncpa [#allocation4], 0  ;;  %s27_s17 = sshll.u32 %s553_s1, 4  ;;  %s28_s17 = int_to_ptr.vmem [resolvable:$true] %s27_s17 }
   0x3   :  { %12 = vsyncpa [#allocation10], 0  ;;  %s359_s20 = scalar_lea.hbm %s552_s0, 16 }
   0x4   :  { %p360_p0 = scmp.ne.s32.totalorder %s552_s0, %s359_s20  ;;  %p363_p1 = scmp.lt.u32.totalorder %s359_s20, %s552_s0 }
   0x6   :  { %p365_p2 = pnand %p363_p1, %p360_p0 }
   0x8   :  { %368 = shalt.err (!%p365_p2)
}
   0x9   :  { %s433_s25 = smov [#allocation3]   ;;  %s369_s1 = scalar_lea.vmem %s28_s17, 16 }
   0xa   :  { %20 = dma.hbm_to_smem %s552_s0, 16, %s433_s25, [#allocation5]  }
   0xb   :  { %p370_p3 = scmp.ne.s32.totalorder %s28_s17, %s369_s1  ;;  %p374_p4 = scmp.lt.s32.totalorder %s28_s17, %s28_s17 }
   0xc   :  { %p375_p5 = scmp.lt.s32.totalorder %s369_s1, %s369_s1 }
   0xe   :  { %p376_p6 = por %p375_p5, %p374_p4 }
  0x10   :  { %p377_p7 = pnand %p376_p6, %p370_p3 }
  0x12   :  { %380 = shalt.err (!%p377_p7)
}
  0x13   :  { %s434_s28 = smov [#allocation7]   ;;  %s435_s29 = smov [#allocation8]  }
  0x14   :  { %30 = dma.vmem_to_smem %s28_s17, 16, %s434_s28, [#allocation6]  }
  0x15   :  { %s36_s30 = sshll.u32 %s435_s29, 4  ;;  %s381_s7 = scalar_lea.hbm %s554_s2, 1664  ;;  %s37_s30 = int_to_ptr.vmem [resolvable:$true] %s36_s30 }
  0x16   :  { %p382_p8 = scmp.ne.s32.totalorder %s554_s2, %s381_s7  ;;  %p385_p9 = scmp.lt.u32.totalorder %s381_s7, %s554_s2 }
  0x18   :  { %p387_p10 = pnand %p385_p9, %p382_p8 }
  0x1a   :  { %390 = shalt.err (!%p387_p10)
}
  0x1b   :  { %s391_s11 = scalar_lea.vmem %s37_s30, 1664  ;;  %p396_p12 = scmp.lt.s32.totalorder %s37_s30, %s37_s30 }
  0x1c   :  { %p392_p11 = scmp.ne.s32.totalorder %s37_s30, %s391_s11  ;;  %p397_p13 = scmp.lt.s32.totalorder %s391_s11, %s391_s11 }
  0x1e   :  { %p398_p0 = por %p397_p13, %p396_p12 }
  0x20   :  { %p399_p1 = pnand %p398_p0, %p392_p11 }
  0x22   :  { %402 = shalt.err (!%p399_p1)
}
  0x23   :  { %s436_s12 = smov 128   ;;  %s437_s13 = smov 8  }
  0x24   :  { %42 = dma.hbm_to_vmem [thread:$0]  %s554_s2, 1664, %s37_s30, [#allocation4], %s436_s12, %s436_s12, %s437_s13  }
  0x25   :  { %s438_s16 = smov [#allocation9]   ;;  %s403_s20 = scalar_lea.hbm %s555_s3, 1664 }
  0x26   :  { %s48_s17 = sshll.u32 %s438_s16, 4  ;;  %p404_p2 = scmp.ne.s32.totalorder %s555_s3, %s403_s20  ;;  %s49_s17 = int_to_ptr.vmem [resolvable:$true] %s48_s17 }
  0x27   :  { %p407_p3 = scmp.lt.u32.totalorder %s403_s20, %s555_s3 }
  0x29   :  { %p409_p4 = pnand %p407_p3, %p404_p2 }
  0x2b   :  { %412 = shalt.err (!%p409_p4)
}
  0x2c   :  { %s413_s25 = scalar_lea.vmem %s49_s17, 1664  ;;  %p418_p6 = scmp.lt.s32.totalorder %s49_s17, %s49_s17 }
  0x2d   :  { %p414_p5 = scmp.ne.s32.totalorder %s49_s17, %s413_s25  ;;  %p419_p7 = scmp.lt.s32.totalorder %s413_s25, %s413_s25 }
  0x2f   :  { %p420_p8 = por %p419_p7, %p418_p6 }
  0x31   :  { %p421_p9 = pnand %p420_p8, %p414_p5 }
  0x33   :  { %424 = shalt.err (!%p421_p9)
}
  0x34   :  { %54 = dma.hbm_to_vmem [thread:$0]  %s555_s3, 1664, %s49_s17, [#allocation10], %s436_s12, %s436_s12, %s437_s13  }
  0x35   :  { %425 = dma.done.wait [#allocation5], 16  }
  0x36   :  { %426 = vsyncadd [#allocation5], 4294967280 }
  0x37   :  { %427 = dma.done.wait [#allocation6], 16  }
  0x38   :  { %428 = vsyncadd [#allocation6], 4294967280 }
  0x39   :  { %429 = dma.done.wait [#allocation4], 1664  }
  0x3a   :  { %430 = vsyncadd [#allocation4], 4294965632 }
  0x3b   :  { %431 = dma.done.wait [#allocation10], 1664  }
  0x3c   :  { %432 = vsyncadd [#allocation10], 4294965632 }
  0x3d   :  { %67 = sfence }
  0x3e   :  { %s69_s27 = sld [smem:[#allocation3]]  ;;  %v439_v0 = vmov 0.0   ;;  %s236_s28 = sld [smem:[#allocation3 + $0x1]]  ;;  %vm200_vm0 = vcmask 7168  }
  0x3f   :  { %s74_s1 = sld [smem:[#allocation7]]  ;;  %68 = vst [vmem:[#allocation2] sm:$0xff] %v439_v0  ;;  %s504_s29 = sld [smem:[#allocation7 + $0x1]] }
  0x40   :  { %s506_s30 = sld [smem:[#allocation3 + $0x2]]  ;;  %s510_s3 = sld [smem:[#allocation3 + $0x3]] }
  0x41   :  { %s508_s5 = sld [smem:[#allocation7 + $0x2]]  ;;  %s512_s6 = sld [smem:[#allocation7 + $0x3]] }
  0x42   :  { %s514_s7 = sld [smem:[#allocation3 + $0x4]]  ;;  %s518_s9 = sld [smem:[#allocation3 + $0x5]] }
  0x43   :  { %s516_s8 = sld [smem:[#allocation7 + $0x4]]  ;;  %s520_s0 = sld [smem:[#allocation7 + $0x5]] }
  0x44   :  { %p70_p10 = scmp.gt.s32.totalorder %s69_s27, 0  ;;  %p226_p11 = scmp.lt.s32.totalorder %s69_s27, 99 }
  0x45   :  { %p75_p12 = scmp.gt.s32.totalorder %s74_s1, 0  ;;  %p231_p13 = scmp.lt.s32.totalorder %s74_s1, 99 }
  0x46   :  { %s558_s27 = smov (!%p70_p10, %s69_s27), 0  ;;  %p86_p0 = scmp.gt.s32.totalorder %s236_s28, 0 }
  0x47   :  { %s560_s1 = smov (!%p75_p12, %s74_s1), 0  ;;  %s562_s27 = smov (!%p226_p11, %s558_s27), 99 }
  0x48   :  { %s564_s1 = smov (!%p231_p13, %s560_s1), 99  ;;  %s79_s10 = scalar_lea.vmem [#allocation8], %s562_s27 }
  0x49   :  { %v80_v1 = vld [vmem:[%s79_s10] sm:$0x1]  ;;  %p237_p1 = scmp.lt.s32.totalorder %s236_s28, 99  ;;  %s81_s11 = scalar_lea.vmem [#allocation9], %s564_s1 }
  0x4a   :  { %v82_v2 = vld [vmem:[%s81_s11] sm:$0x1]  ;;  %s566_s28 = smov (!%p86_p0, %s236_s28), 0  ;;  %p91_p2 = scmp.gt.s32.totalorder %s504_s29, 0 }
  0x4b   :  { %v83_v3 = vmul.f32 %v82_v2, %v80_v1  ;;  %p243_p3 = scmp.lt.s32.totalorder %s504_s29, 99  ;;  %s568_s28 = smov (!%p237_p1, %s566_s28), 99 }
  0x4c   :  { %s570_s29 = smov (!%p91_p2, %s504_s29), 0  ;;  %p102_p4 = scmp.gt.s32.totalorder %s506_s30, 0 }
  0x4d   :  { %84 = vst [vmem:[#allocation2] sm:$0x1] %v83_v3  ;;  %s572_s29 = smov (!%p243_p3, %s570_s29), 99  ;;  %s95_s12 = scalar_lea.vmem [#allocation8], %s568_s28 }
  0x4e   :  { %v96_v4 = vld [vmem:[%s95_s12] sm:$0x1]  ;;  %s103_s13 = scalar_select %p102_p4, %s506_s30, 0 }
  0x4f   :  { %p249_p5 = scmp.lt.s32.totalorder %s506_s30, 99  ;;  %s97_s14 = scalar_lea.vmem [#allocation9], %s572_s29 }
  0x50   :  { %v98_v5 = vld [vmem:[%s97_s14] sm:$0x1]  ;;  %p107_p6 = scmp.gt.s32.totalorder %s508_s5, 0  ;;  %p255_p7 = scmp.lt.s32.totalorder %s508_s5, 99 }
  0x51   :  { %v99_v6 = vmul.f32 %v98_v5, %v96_v4  ;;  %s574_s13 = smov (!%p249_p5, %s103_s13), 99  ;;  %p118_p8 = scmp.gt.s32.totalorder %s510_s3, 0 }
  0x52   :  { %s576_s5 = smov (!%p107_p6, %s508_s5), 0  ;;  %s111_s15 = scalar_lea.vmem [#allocation8], %s574_s13 }
  0x53   :  { %100 = vst [vmem:[#allocation2 + $0x1] sm:$0x1] %v99_v6  ;;  %s578_s5 = smov (!%p255_p7, %s576_s5), 99  ;;  %v112_v7 = vld [vmem:[%s111_s15] sm:$0x1]  ;;  %p261_p9 = scmp.lt.s32.totalorder %s510_s3, 99 }
  0x54   :  { %s119_s16 = scalar_select %p118_p8, %s510_s3, 0 }
  0x55   :  { %s113_s17 = scalar_lea.vmem [#allocation9], %s578_s5  ;;  %p123_p10 = scmp.gt.s32.totalorder %s512_s6, 0 }
  0x56   :  { %v114_v8 = vld [vmem:[%s113_s17] sm:$0x1]  ;;  %p267_p11 = scmp.lt.s32.totalorder %s512_s6, 99  ;;  %s580_s16 = smov (!%p261_p9, %s119_s16), 99 }
  0x57   :  { %v115_v9 = vmul.f32 %v114_v8, %v112_v7  ;;  %s582_s6 = smov (!%p123_p10, %s512_s6), 0  ;;  %p134_p12 = scmp.gt.s32.totalorder %s514_s7, 0 }
  0x58   :  { %s584_s6 = smov (!%p267_p11, %s582_s6), 99  ;;  %s127_s18 = scalar_lea.vmem [#allocation8], %s580_s16 }
  0x59   :  { %116 = vst [vmem:[#allocation2 + $0x2] sm:$0x1] %v115_v9  ;;  %v128_v10 = vld [vmem:[%s127_s18] sm:$0x1]  ;;  %s135_s19 = scalar_select %p134_p12, %s514_s7, 0 }
  0x5a   :  { %p273_p13 = scmp.lt.s32.totalorder %s514_s7, 99  ;;  %s129_s20 = scalar_lea.vmem [#allocation9], %s584_s6 }
  0x5b   :  { %v130_v11 = vld [vmem:[%s129_s20] sm:$0x1]  ;;  %p139_p0 = scmp.gt.s32.totalorder %s516_s8, 0  ;;  %p279_p1 = scmp.lt.s32.totalorder %s516_s8, 99 }
  0x5c   :  { %v131_v12 = vmul.f32 %v130_v11, %v128_v10  ;;  %s586_s19 = smov (!%p273_p13, %s135_s19), 99  ;;  %p150_p2 = scmp.gt.s32.totalorder %s518_s9, 0 }
  0x5d   :  { %s588_s8 = smov (!%p139_p0, %s516_s8), 0  ;;  %s143_s21 = scalar_lea.vmem [#allocation8], %s586_s19 }
  0x5e   :  { %132 = vst [vmem:[#allocation2 + $0x3] sm:$0x1] %v131_v12  ;;  %s590_s8 = smov (!%p279_p1, %s588_s8), 99  ;;  %v144_v13 = vld [vmem:[%s143_s21] sm:$0x1]  ;;  %p285_p3 = scmp.lt.s32.totalorder %s518_s9, 99 }
  0x5f   :  { %s151_s22 = scalar_select %p150_p2, %s518_s9, 0 }
  0x60   :  { %s145_s23 = scalar_lea.vmem [#allocation9], %s590_s8  ;;  %p155_p4 = scmp.gt.s32.totalorder %s520_s0, 0 }
  0x61   :  { %v146_v14 = vld [vmem:[%s145_s23] sm:$0x1]  ;;  %p291_p5 = scmp.lt.s32.totalorder %s520_s0, 99  ;;  %s592_s22 = smov (!%p285_p3, %s151_s22), 99 }
  0x62   :  { %v147_v15 = vmul.f32 %v146_v14, %v144_v13  ;;  %s594_s0 = smov (!%p155_p4, %s520_s0), 0  ;;  %s296_s24 = sld [smem:[#allocation3 + $0x6]] }
  0x63   :  { %s596_s0 = smov (!%p291_p5, %s594_s0), 99  ;;  %s159_s25 = scalar_lea.vmem [#allocation8], %s592_s22 }
  0x64   :  { %148 = vst [vmem:[#allocation2 + $0x4] sm:$0x1] %v147_v15  ;;  %v160_v16 = vld [vmem:[%s159_s25] sm:$0x1]  ;;  %s302_s2 = sld [smem:[#allocation7 + $0x6]]  ;;  %s161_s26 = scalar_lea.vmem [#allocation9], %s596_s0 }
  0x65   :  { %v162_v17 = vld [vmem:[%s161_s26] sm:$0x1]  ;;  %s308_s27 = sld [smem:[#allocation3 + $0x7]] }
  0x66   :  { %v163_v18 = vmul.f32 %v162_v17, %v160_v16  ;;  %s314_s1 = sld [smem:[#allocation7 + $0x7]] }
  0x68   :  { %p166_p6 = scmp.gt.s32.totalorder %s296_s24, 0  ;;  %p297_p7 = scmp.lt.s32.totalorder %s296_s24, 99  ;;  %164 = vst [vmem:[#allocation2 + $0x5] sm:$0x1] %v163_v18 }
  0x6a   :  { %s598_s24 = smov (!%p166_p6, %s296_s24), 0  ;;  %p171_p8 = scmp.gt.s32.totalorder %s302_s2, 0 }
  0x6b   :  { %p303_p9 = scmp.lt.s32.totalorder %s302_s2, 99  ;;  %s600_s24 = smov (!%p297_p7, %s598_s24), 99 }
  0x6c   :  { %s602_s2 = smov (!%p171_p8, %s302_s2), 0  ;;  %p182_p10 = scmp.gt.s32.totalorder %s308_s27, 0 }
  0x6d   :  { %s604_s2 = smov (!%p303_p9, %s602_s2), 99  ;;  %s175_s28 = scalar_lea.vmem [#allocation8], %s600_s24 }
  0x6e   :  { %v176_v19 = vld [vmem:[%s175_s28] sm:$0x1]  ;;  %s183_s29 = scalar_select %p182_p10, %s308_s27, 0 }
  0x6f   :  { %p309_p11 = scmp.lt.s32.totalorder %s308_s27, 99  ;;  %s177_s30 = scalar_lea.vmem [#allocation9], %s604_s2 }
  0x70   :  { %v178_v20 = vld [vmem:[%s177_s30] sm:$0x1]  ;;  %p187_p12 = scmp.gt.s32.totalorder %s314_s1, 0  ;;  %p315_p13 = scmp.lt.s32.totalorder %s314_s1, 99 }
  0x71   :  { %v179_v21 = vmul.f32 %v178_v20, %v176_v19  ;;  %s606_s29 = smov (!%p309_p11, %s183_s29), 99 }
  0x72   :  { %s608_s1 = smov (!%p187_p12, %s314_s1), 0  ;;  %s191_s5 = scalar_lea.vmem [#allocation8], %s606_s29 }
  0x73   :  { %180 = vst [vmem:[#allocation2 + $0x6] sm:$0x1] %v179_v21  ;;  %s610_s1 = smov (!%p315_p13, %s608_s1), 99  ;;  %v192_v22 = vld [vmem:[%s191_s5] sm:$0x1] }
  0x74   :  { %s193_s3 = scalar_lea.vmem [#allocation9], %s610_s1 }
  0x75   :  { %v194_v23 = vld [vmem:[%s193_s3] sm:$0x1] }
  0x76   :  { %v195_v24 = vmul.f32 %v194_v23, %v192_v22 }
  0x78   :  { %196 = vst [vmem:[#allocation2 + $0x7] sm:$0x1] %v195_v24 }
  0x7f   :  { %v197_v25 = vld [vmem:[#allocation2] sm:$0xff] }
  0x80   :  { %198 = vadd.xlane.f32.xlu0 %v197_v25 }
 0x10d   :  { %v199_v26 = vpop.xlane.xlu0 %198 }
 0x10e   :  { %201 = vst.msk [vmem:[%s556_s4] sm:$0xff] %vm200_vm0, %v199_v26 }
 0x10f   :  { %206 = vsyncpa [#allocation4], 1 }
 0x110   :  { %207 = vsyncpa [#allocation10], 1 }
 0x111   :  { %208 = vsyncpa [#allocation5], 1 }
 0x112   :  { %209 = vsyncpa [#allocation6], 1 }

</bundles_post_ra>
